<compile_context>
chip_gen: v6e
topology: v6e:2x2x1
jax: 0.10.0
libtpu: 0.0.40
codegen_flags: <defaults>
</compile_context>

<pallas_src>
import jax
import jax.numpy as jnp
from jax.experimental import pallas as pl
from jax.experimental.pallas import tpu as pltpu


def mlp_kernel(x_ref, w1_ref, b1_ref, w2_ref, b2_ref, w3_ref, b3_ref, o_ref):
    """Fused 3-layer MLP forward: relu(relu(x@W1+b1)@W2+b2)@W3+b3.

    Weights are (in, out); biases are (1, out) and broadcast over the batch
    tile. Accumulation is f32 on the MXU; elementwise bias+ReLU run on the VPU.
    """
    x = x_ref[...]

    h1 = jnp.dot(x, w1_ref[...], preferred_element_type=jnp.float32) + b1_ref[...]
    h1 = jnp.maximum(h1, 0.0)

    h2 = jnp.dot(h1, w2_ref[...], preferred_element_type=jnp.float32) + b2_ref[...]
    h2 = jnp.maximum(h2, 0.0)

    out = jnp.dot(h2, w3_ref[...], preferred_element_type=jnp.float32) + b3_ref[...]
    o_ref[...] = out.astype(o_ref.dtype)


def _round_up(n, m):
    return ((n + m - 1) // m) * m


def network_forward(state, params, *, batch_tile=128):
    """Batch-tiled Pallas call. Pads batch to a sublane-aligned tile and the
    action dim to a lane-dense multiple of 128, then slices the padding off."""
    w1, b1, w2, b2, w3, b3 = params
    B, S = state.shape
    L = w1.shape[1]
    A = w3.shape[1]

    # Lane-dense output: pad action dim so the final store is unmasked full-lane.
    A_pad = _round_up(A, 128)
    if A_pad != A:
        w3p = jnp.zeros((L, A_pad), w3.dtype).at[:, :A].set(w3)
        b3p = jnp.zeros((1, A_pad), b3.dtype).at[:, :A].set(b3)
    else:
        w3p, b3p = w3, b3

    # Batch tile: multiple of 8 sublanes, capped at batch_tile; pad B to divide.
    TB = min(batch_tile, _round_up(B, 8))
    B_pad = _round_up(B, TB)
    if B_pad != B:
        xp = jnp.zeros((B_pad, S), state.dtype).at[:B, :].set(state)
    else:
        xp = state

    grid = (B_pad // TB,)

    # Weights/biases: full-array blocks, constant index_map -> stay resident in
    # VMEM across all grid iterations (they are tiny).
    def whole(a):
        return pl.BlockSpec(a.shape, lambda i: (0,) * a.ndim)

    flops = 2 * B_pad * (S * L + L * L + L * A_pad)
    bytes_accessed = (
        xp.size * xp.dtype.itemsize
        + sum(a.size * a.dtype.itemsize for a in (w1, b1, w2, b2, w3p, b3p))
        + B_pad * A_pad * 4
    )

    out = pl.pallas_call(
        mlp_kernel,
        out_shape=jax.ShapeDtypeStruct((B_pad, A_pad), jnp.float32),
        grid=grid,
        in_specs=[
            pl.BlockSpec((TB, S), lambda i: (i, 0)),
            whole(w1), whole(b1), whole(w2), whole(b2), whole(w3p), whole(b3p),
        ],
        out_specs=pl.BlockSpec((TB, A_pad), lambda i: (i, 0)),
        compiler_params=pltpu.CompilerParams(
            dimension_semantics=("parallel",),
        ),
        cost_estimate=pl.CostEstimate(
            flops=flops, transcendentals=0, bytes_accessed=bytes_accessed
        ),
    )(xp, w1, b1, w2, b2, w3p, b3p)

    return out[:B, :A]


def init_params(key, state_size, layer_size, action_size):
    """Deterministic parameter init mirroring the PyTorch module:
    head_1 / ff_1 weights: kaiming-normal (fan_in, relu gain = sqrt(2));
    ff_2 weight + all biases: default nn.Linear uniform(-1/sqrt(fan_in), +)."""
    k = jax.random.split(key, 6)

    def kaiming_normal(k, fan_in, fan_out):
        std = jnp.sqrt(2.0 / fan_in)
        # stored as (in, out) = transposed relative to torch's (out, in)
        return (std * jax.random.normal(k, (fan_out, fan_in), jnp.float32)).T

    def uniform_linear(k, fan_in, shape):
        bound = 1.0 / jnp.sqrt(fan_in)
        return jax.random.uniform(k, shape, jnp.float32, -bound, bound)

    w1 = kaiming_normal(k[0], state_size, layer_size)                  # (S, L)
    b1 = uniform_linear(k[1], state_size, (1, layer_size))             # (1, L)
    w2 = kaiming_normal(k[2], layer_size, layer_size)                  # (L, L)
    b2 = uniform_linear(k[3], layer_size, (1, layer_size))             # (1, L)
    w3 = uniform_linear(k[4], layer_size, (layer_size, action_size))   # (L, A)
    b3 = uniform_linear(k[5], layer_size, (1, action_size))            # (1, A)
    return (w1, b1, w2, b2, w3, b3)


def _reference(state, params):
    w1, b1, w2, b2, w3, b3 = params
    h = jnp.maximum(state @ w1 + b1, 0.0)
    h = jnp.maximum(h @ w2 + b2, 0.0)
    return h @ w3 + b3


if __name__ == "__main__":
    # Small shapes consistent with the module's forward:
    # state_size=16, layer_size=32, action_size=8, batch=2
    state_size, layer_size, action_size, batch = 16, 32, 8, 2

    key = jax.random.PRNGKey(0)
    pkey, xkey, xkey2 = jax.random.split(key, 3)
    params = init_params(pkey, state_size, layer_size, action_size)

    # Primary small-shape check (B=2 -> single 8-row tile, grid=(1,)).
    state = jax.random.normal(xkey, (batch, state_size), jnp.float32)
    out = network_forward(state, params)
    jax.block_until_ready(out)
    ref = _reference(state, params)
    assert out.shape == (batch, action_size)
    assert jnp.allclose(out, ref, atol=1e-5, rtol=1e-5)

    # Secondary check exercising the batch grid + padding path (grid > 1).
    big_batch = 160  # pads to 256 = 2 tiles of 128
    state_big = jax.random.normal(xkey2, (big_batch, state_size), jnp.float32)
    out_big = network_forward(state_big, params)
    jax.block_until_ready(out_big)
    ref_big = _reference(state_big, params)
    assert out_big.shape == (big_batch, action_size)
    assert jnp.allclose(out_big, ref_big, atol=1e-5, rtol=1e-5)

    print("KERNEL_OK")
</pallas_src>

<mosaic_0001>
module attributes {stable_mosaic.version = 11 : i64} {
  func.func @mlp_kernel(%arg0: i32, %arg1: memref<8x16xf32, #tpu.memory_space<vmem>>, %arg2: memref<16x32xf32, #tpu.memory_space<vmem>>, %arg3: memref<1x32xf32, #tpu.memory_space<vmem>>, %arg4: memref<32x32xf32, #tpu.memory_space<vmem>>, %arg5: memref<1x32xf32, #tpu.memory_space<vmem>>, %arg6: memref<32x128xf32, #tpu.memory_space<vmem>>, %arg7: memref<1x128xf32, #tpu.memory_space<vmem>>, %arg8: memref<8x128xf32, #tpu.memory_space<vmem>>) attributes {dimension_semantics = [#tpu.dimension_semantics<parallel>], iteration_bounds = array<i64: 1>, scalar_prefetch = 0 : i64, scratch_operands = 0 : i64, tpu.core_type = #tpu.core_type<tc>, window_params = [{transform_indices = @transform_0, window_bounds = array<i64: 8, 16>}, {pipeline_mode = #tpu.pipeline_mode<synchronous>, transform_indices = @transform_1, window_bounds = array<i64: 16, 32>}, {pipeline_mode = #tpu.pipeline_mode<synchronous>, transform_indices = @transform_2, window_bounds = array<i64: 1, 32>}, {pipeline_mode = #tpu.pipeline_mode<synchronous>, transform_indices = @transform_3, window_bounds = array<i64: 32, 32>}, {pipeline_mode = #tpu.pipeline_mode<synchronous>, transform_indices = @transform_4, window_bounds = array<i64: 1, 32>}, {pipeline_mode = #tpu.pipeline_mode<synchronous>, transform_indices = @transform_5, window_bounds = array<i64: 32, 128>}, {pipeline_mode = #tpu.pipeline_mode<synchronous>, transform_indices = @transform_6, window_bounds = array<i64: 1, 128>}, {transform_indices = @transform_7, window_bounds = array<i64: 8, 128>}]} {
    %c0 = arith.constant 0 : index
    %c0_0 = arith.constant 0 : index
    %0 = vector.load %arg1[%c0, %c0_0] : memref<8x16xf32, #tpu.memory_space<vmem>>, vector<8x16xf32>
    %c0_1 = arith.constant 0 : index
    %c0_2 = arith.constant 0 : index
    %1 = vector.load %arg2[%c0_1, %c0_2] : memref<16x32xf32, #tpu.memory_space<vmem>>, vector<16x32xf32>
    %cst = arith.constant dense<0.000000e+00> : vector<8x32xf32>
    %2 = tpu.matmul %0, %1, %cst {dimension_numbers = #tpu.dot_dimension_numbers<[1], [0], [0], [1], [0, 0, 1, 1], [], []>} : vector<8x16xf32>, vector<16x32xf32>, vector<8x32xf32> -> vector<8x32xf32>
    %c0_3 = arith.constant 0 : index
    %c0_4 = arith.constant 0 : index
    %3 = vector.load %arg3[%c0_3, %c0_4] : memref<1x32xf32, #tpu.memory_space<vmem>>, vector<1x32xf32>
    %4 = vector.broadcast %3 : vector<1x32xf32> to vector<8x32xf32>
    %5 = arith.addf %2, %4 : vector<8x32xf32>
    %cst_5 = arith.constant 0.000000e+00 : f32
    %6 = vector.broadcast %cst_5 : f32 to vector<8x32xf32>
    %7 = arith.maximumf %5, %6 : vector<8x32xf32>
    %c0_6 = arith.constant 0 : index
    %c0_7 = arith.constant 0 : index
    %8 = vector.load %arg4[%c0_6, %c0_7] : memref<32x32xf32, #tpu.memory_space<vmem>>, vector<32x32xf32>
    %cst_8 = arith.constant dense<0.000000e+00> : vector<8x32xf32>
    %9 = tpu.matmul %7, %8, %cst_8 {dimension_numbers = #tpu.dot_dimension_numbers<[1], [0], [0], [1], [0, 0, 1, 1], [], []>} : vector<8x32xf32>, vector<32x32xf32>, vector<8x32xf32> -> vector<8x32xf32>
    %c0_9 = arith.constant 0 : index
    %c0_10 = arith.constant 0 : index
    %10 = vector.load %arg5[%c0_9, %c0_10] : memref<1x32xf32, #tpu.memory_space<vmem>>, vector<1x32xf32>
    %11 = vector.broadcast %10 : vector<1x32xf32> to vector<8x32xf32>
    %12 = arith.addf %9, %11 : vector<8x32xf32>
    %cst_11 = arith.constant 0.000000e+00 : f32
    %13 = vector.broadcast %cst_11 : f32 to vector<8x32xf32>
    %14 = arith.maximumf %12, %13 : vector<8x32xf32>
    %c0_12 = arith.constant 0 : index
    %c0_13 = arith.constant 0 : index
    %15 = vector.load %arg6[%c0_12, %c0_13] : memref<32x128xf32, #tpu.memory_space<vmem>>, vector<32x128xf32>
    %cst_14 = arith.constant dense<0.000000e+00> : vector<8x128xf32>
    %16 = tpu.matmul %14, %15, %cst_14 {dimension_numbers = #tpu.dot_dimension_numbers<[1], [0], [0], [1], [0, 0, 1, 1], [], []>} : vector<8x32xf32>, vector<32x128xf32>, vector<8x128xf32> -> vector<8x128xf32>
    %c0_15 = arith.constant 0 : index
    %c0_16 = arith.constant 0 : index
    %17 = vector.load %arg7[%c0_15, %c0_16] : memref<1x128xf32, #tpu.memory_space<vmem>>, vector<1x128xf32>
    %18 = vector.broadcast %17 : vector<1x128xf32> to vector<8x128xf32>
    %19 = arith.addf %16, %18 : vector<8x128xf32>
    %c0_17 = arith.constant 0 : index
    %c0_18 = arith.constant 0 : index
    %20 = vector.load %arg8[%c0_17, %c0_18] : memref<8x128xf32, #tpu.memory_space<vmem>>, vector<8x128xf32>
    tpu.vector_store %arg8[%c0_17, %c0_18], %19 {strides = array<i32>} : memref<8x128xf32, #tpu.memory_space<vmem>>, vector<8x128xf32>,
    return
  }
  func.func @transform_0(%arg0: i32) -> (i32, i32) {
    %c0_i32 = arith.constant 0 : i32
    %c0_i32_0 = arith.constant 0 : i32
    return %arg0, %c0_i32 : i32, i32
  }
  func.func @transform_1(%arg0: i32) -> (i32, i32) {
    %c0_i32 = arith.constant 0 : i32
    %c0_i32_0 = arith.constant 0 : i32
    %c0_i32_1 = arith.constant 0 : i32
    return %c0_i32, %c0_i32_0 : i32, i32
  }
  func.func @transform_2(%arg0: i32) -> (i32, i32) {
    %c0_i32 = arith.constant 0 : i32
    %c0_i32_0 = arith.constant 0 : i32
    %c0_i32_1 = arith.constant 0 : i32
    return %c0_i32, %c0_i32_0 : i32, i32
  }
  func.func @transform_3(%arg0: i32) -> (i32, i32) {
    %c0_i32 = arith.constant 0 : i32
    %c0_i32_0 = arith.constant 0 : i32
    %c0_i32_1 = arith.constant 0 : i32
    return %c0_i32, %c0_i32_0 : i32, i32
  }
  func.func @transform_4(%arg0: i32) -> (i32, i32) {
    %c0_i32 = arith.constant 0 : i32
    %c0_i32_0 = arith.constant 0 : i32
    %c0_i32_1 = arith.constant 0 : i32
    return %c0_i32, %c0_i32_0 : i32, i32
  }
  func.func @transform_5(%arg0: i32) -> (i32, i32) {
    %c0_i32 = arith.constant 0 : i32
    %c0_i32_0 = arith.constant 0 : i32
    %c0_i32_1 = arith.constant 0 : i32
    return %c0_i32, %c0_i32_0 : i32, i32
  }
  func.func @transform_6(%arg0: i32) -> (i32, i32) {
    %c0_i32 = arith.constant 0 : i32
    %c0_i32_0 = arith.constant 0 : i32
    %c0_i32_1 = arith.constant 0 : i32
    return %c0_i32, %c0_i32_0 : i32, i32
  }
  func.func @transform_7(%arg0: i32) -> (i32, i32) {
    %c0_i32 = arith.constant 0 : i32
    %c0_i32_0 = arith.constant 0 : i32
    return %arg0, %c0_i32 : i32, i32
  }
}

</mosaic_0001>

<bundles_post_ra>
// kernel: tpu_custom_call.1
= control target key start
LH: loop header
LB: loop body
LE: loop exit
PB: predicated region body
PF: predicated region fallthrough
CT: control target
= control target key end

     0   :  { %12 = vsyncpa [#allocation3], 0  ;;  %s605_s0 = inlined_call_operand.hbm [shape: f32[8,16], index: 0, kind: input, shape index: {}]   ;;  %s606_s1 = inlined_call_operand.hbm [shape: f32[16,32], index: 1, kind: input, shape index: {}]   ;;  %s607_s2 = inlined_call_operand.vmem [shape: f32[1,32], index: 2, kind: input, shape index: {}]   ;;  %s608_s3 = inlined_call_operand.hbm [shape: f32[32,32], index: 3, kind: input, shape index: {}]   ;;  %s609_s4 = inlined_call_operand.vmem [shape: f32[1,32], index: 4, kind: input, shape index: {}]   ;;  %s610_s5 = inlined_call_operand.hbm [shape: f32[32,128], index: 5, kind: input, shape index: {}]   ;;  %s611_s6 = inlined_call_operand.vmem [shape: f32[1,128], index: 6, kind: input, shape index: {}]   ;;  %s612_s7 = inlined_call_operand.hbm [shape: f32[8,128], index: 7, kind: output, shape index: {}]  }
   0x1   :  { %13 = vsyncpa [#allocation6], 0 }
   0x2   :  { %14 = vsyncpa [#allocation9], 0 }
   0x3   :  { %15 = vsyncpa [#allocation4], 0  ;;  %s518_s24 = smov [#allocation5]  }
   0x4   :  { %s31_s25 = sshll.u32 %s518_s24, 4  ;;  %s32_s25 = int_to_ptr.vmem [resolvable:$true] %s31_s25 }
   0x5   :  { %s418_s26 = scalar_lea.vmem %s32_s25, 256  ;;  %p423_p1 = scmp.lt.s32.totalorder %s32_s25, %s32_s25 }
   0x6   :  { %p419_p0 = scmp.ne.s32.totalorder %s32_s25, %s418_s26  ;;  %p424_p2 = scmp.lt.s32.totalorder %s418_s26, %s418_s26 }
   0x8   :  { %p425_p3 = por %p424_p2, %p423_p1 }
   0xa   :  { %p426_p4 = pnand %p425_p3, %p419_p0 }
   0xc   :  { %429 = shalt.err (!%p426_p4)
}
   0xd   :  { %s519_s27 = smov 128   ;;  %s520_s28 = smov 8  }
   0xe   :  { %37 = dma.hbm_to_vmem [thread:$0]  %s606_s1, 256, %s32_s25, [#allocation6], %s519_s27, %s519_s27, %s520_s28  }
   0xf   :  { %s521_s8 = smov [#allocation2]   ;;  %s522_s10 = smov [#allocation7]  }
  0x10   :  { %s22_s9 = sshll.u32 %s521_s8, 4  ;;  %s45_s11 = sshll.u32 %s522_s10, 4  ;;  %s23_s9 = int_to_ptr.vmem [resolvable:$true] %s22_s9  ;;  %s46_s11 = int_to_ptr.vmem [resolvable:$true] %s45_s11 }
  0x11   :  { %s438_s12 = scalar_lea.vmem %s23_s9, 128  ;;  %p443_p6 = scmp.lt.s32.totalorder %s23_s9, %s23_s9 }
  0x12   :  { %p439_p5 = scmp.ne.s32.totalorder %s23_s9, %s438_s12  ;;  %p444_p7 = scmp.lt.s32.totalorder %s438_s12, %s438_s12 }
  0x14   :  { %p445_p8 = por %p444_p7, %p443_p6 }
  0x16   :  { %p446_p9 = pnand %p445_p8, %p439_p5 }
  0x18   :  { %449 = shalt.err (!%p446_p9)
}
  0x19   :  { %25 = dma.hbm_to_vmem [thread:$0]  %s605_s0, 128, %s23_s9, [#allocation3]  }
  0x1a   :  { %s458_s15 = scalar_lea.vmem %s46_s11, 512  ;;  %p463_p11 = scmp.lt.s32.totalorder %s46_s11, %s46_s11 }
  0x1b   :  { %p459_p10 = scmp.ne.s32.totalorder %s46_s11, %s458_s15  ;;  %p464_p12 = scmp.lt.s32.totalorder %s458_s15, %s458_s15 }
  0x1d   :  { %p465_p13 = por %p464_p12, %p463_p11 }
  0x1f   :  { %p466_p0 = pnand %p465_p13, %p459_p10 }
  0x21   :  { %469 = shalt.err (!%p466_p0)
}
  0x22   :  { %51 = dma.hbm_to_vmem [thread:$0]  %s608_s3, 512, %s46_s11, [#allocation6], %s519_s27, %s519_s27, %s520_s28  }
  0x23   :  { %s523_s17 = smov [#allocation8]  }
  0x24   :  { %s59_s18 = sshll.u32 %s523_s17, 4  ;;  %s60_s18 = int_to_ptr.vmem [resolvable:$true] %s59_s18 }
  0x25   :  { %s478_s19 = scalar_lea.vmem %s60_s18, 512  ;;  %p483_p2 = scmp.lt.s32.totalorder %s60_s18, %s60_s18 }
  0x26   :  { %p479_p1 = scmp.ne.s32.totalorder %s60_s18, %s478_s19  ;;  %p484_p3 = scmp.lt.s32.totalorder %s478_s19, %s478_s19 }
  0x28   :  { %p485_p4 = por %p484_p3, %p483_p2 }
  0x2a   :  { %p486_p5 = pnand %p485_p4, %p479_p1 }
  0x2c   :  { %489 = shalt.err (!%p486_p5)
}
  0x2d   :  { %65 = dma.hbm_to_vmem [thread:$0]  %s610_s5, 512, %s60_s18, [#allocation9], %s519_s27, %s519_s27, %s520_s28  }
  0x2e   :  { %510 = dma.done.wait [#allocation3], 128  }
  0x2f   :  { %511 = vsyncadd [#allocation3], 4294967168 }
  0x30   :  { %512 = dma.done.wait [#allocation6], 768  }
  0x31   :  { %513 = vsyncadd [#allocation6], 4294966528 }
  0x32   :  { %514 = dma.done.wait [#allocation9], 512  }
  0x33   :  { %515 = vsyncadd [#allocation9], 4294966784  ;;  %v524_v0 = vmov 0.0   ;;  %vm525_vm0 = vmmov 0   ;;  %v82_v1 = vld [vmem:[#allocation5 + $0x8] sm:$0xff]  ;;  %v81_v2 = vld [vmem:[#allocation5] sm:$0xff] }
  0x34   :  { %372 = vmatprep.subr.mxu0 %v524_v0  ;;  %376 = vmatprep.mubr.msk.f32.mxu0 %vm525_vm0, %v524_v0  ;;  %v80_v3 = vld [vmem:[#allocation2] sm:$0xff]  ;;  %vm90_vm1 = vcmask 130048   ;;  %v168_v4 = vld [vmem:[#allocation7 + $0x18] sm:$0xff]  ;;  %v167_v5 = vld [vmem:[#allocation7 + $0x10] sm:$0xff]  ;;  %vm176_vm2 = vcmask 261120   ;;  %s526_s24 = smov [#allocation10]  }
  0x35   :  { %379 = vmatprep.subr.mxu1 %v524_v0  ;;  %387 = vmatprep.mubr.msk.f32.mxu1 %vm525_vm0, %v524_v0  ;;  %v166_v6 = vld [vmem:[#allocation7 + $0x8] sm:$0xff]  ;;  %v165_v7 = vld [vmem:[#allocation7] sm:$0xff]  ;;  %v254_v8 = vld [vmem:[#allocation8 + $0x18] sm:$0xff]  ;;  %s342_s25 = sshll.u32 %s526_s24, 4  ;;  %s343_s25 = int_to_ptr.vmem [resolvable:$true] %s342_s25 }
  0x36   :  { %373 = vmatpush3.msra.mxu0 %v82_v1  ;;  %380 = vmatpush3.msra.mxu1 %v168_v4  ;;  %v353_v9 = vld [vmem:[%s607_s2] ss:$0 sm:$0xff]  ;;  %v253_v14 = vld [vmem:[#allocation8 + $0x10] sm:$0xff]  ;;  %v251_v16 = vld [vmem:[#allocation8] sm:$0xff]  ;;  %s490_s26 = scalar_lea.vmem %s343_s25, 128  ;;  %p495_p7 = scmp.lt.s32.totalorder %s343_s25, %s343_s25 }
  0x37   :  { %374 = vmatprep.subr.mxu0 %v524_v0  ;;  %381 = vmatprep.subr.mxu1 %v524_v0  ;;  %v252_v15 = vld [vmem:[#allocation8 + $0x8] sm:$0xff]  ;;  %p491_p6 = scmp.ne.s32.totalorder %s343_s25, %s490_s26  ;;  %p496_p8 = scmp.lt.s32.totalorder %s490_s26, %s490_s26 }
  0x38   :  { %375 = vmatpush3.msra.mxu0 %v81_v2  ;;  %382 = vmatpush3.msra.mxu1 %v167_v5  ;;  %v355_v17 = vld [vmem:[%s609_s4] ss:$0 sm:$0xff] }
  0x39   :  { %377 = vmatmul.mubr.msk.f32.vlgmr.msra.gmra.mxu0 %vm90_vm1, %v80_v3  ;;  %390 = vmatprep.subr.mxu0 %v524_v0  ;;  %v357_v22 = vld [vmem:[%s611_s6] ss:$0 sm:$0xff]  ;;  %p497_p9 = por %p496_p8, %p495_p7 }
  0x3a   :  { %398 = vmatprep.mubr.msk.f32.mxu0 %vm525_vm0, %v524_v0  ;;  %383 = vmatprep.subr.mxu1 %v524_v0 }
  0x3b   :  { %384 = vmatpush3.msra.mxu1 %v166_v6  ;;  %391 = vmatpush3.msra.mxu0 %v254_v8  ;;  %p498_p10 = pnand %p497_p9, %p491_p6 }
  0x3c   :  { %385 = vmatprep.subr.mxu1 %v524_v0  ;;  %392 = vmatprep.subr.mxu0 %v524_v0 }
  0x3d   :  { %386 = vmatpush3.msra.mxu1 %v165_v7  ;;  %393 = vmatpush3.msra.mxu0 %v253_v14 }
  0x3e   :  { %394 = vmatprep.subr.mxu0 %v524_v0 }
  0x3f   :  { %395 = vmatpush3.msra.mxu0 %v252_v15 }
  0x40   :  { %396 = vmatprep.subr.mxu0 %v524_v0 }
  0x41   :  { %397 = vmatpush3.msra.mxu0 %v251_v16 }
  0xf9   :  { %v160_v10 = vpop.f32.mrf.mxu0 }
  0xfa   :  { %v161_v11 = vadd.f32 %v353_v9, %v160_v10 }
  0xfb   :  { %v378_v12 = vpop.f32.mrf.mxu0 }
  0xfc   :  { %v164_v13 = vmax.f32 %v161_v11, 0.0 }
  0xfe   :  { %388 = vmatmul.mubr.msk.f32.vlgmr.msra.gmra.mxu1 %vm176_vm2, %v164_v13 }
 0x1be   :  { %v246_v18 = vpop.f32.mrf.mxu1 }
 0x1bf   :  { %v247_v19 = vadd.f32 %v355_v17, %v246_v18 }
 0x1c0   :  { %v389_v20 = vpop.f32.mrf.mxu1 }
 0x1c1   :  { %v250_v21 = vmax.f32 %v247_v19, 0.0 }
 0x1c3   :  { %399 = vmatmul.mubr.msk.f32.vlgmr.msra.gmra.mxu0 %vm176_vm2, %v250_v21 }
 0x283   :  { %v331_v23 = vpop.f32.mrf.mxu0 }
 0x284   :  { %v332_v24 = vadd.f32 %v357_v22, %v331_v23 }
 0x285   :  { %v400_v25 = vpop.f32.mrf.mxu0 }
 0x286   :  { %335 = vst [vmem:[#allocation10] sm:$0xff] %v332_v24 }
 0x287   :  { %501 = shalt.err (!%p498_p10)
}
 0x288   :  { %345 = dma.vmem_to_hbm [thread:$0]  %s343_s25, 128, %s612_s7, [#allocation4]  }
 0x289   :  { %516 = dma.done.wait [#allocation4], 128  }
 0x28a   :  { %517 = vsyncadd [#allocation4], 4294967168 }
 0x28b   :  { %349 = vsyncpa [#allocation3], 1 }
 0x28c   :  { %350 = vsyncpa [#allocation6], 1 }
 0x28d   :  { %351 = vsyncpa [#allocation9], 1 }
 0x28e   :  { %352 = vsyncpa [#allocation4], 1 }

</bundles_post_ra>
